<compile_context>
chip_gen: v5e
topology: v5e:2x2
jax: 0.10.0
libtpu: 0.0.40
codegen_flags: <defaults>
</compile_context>

<pallas_src>
import jax
import jax.numpy as jnp
from jax.experimental import pallas as pl
from jax.experimental.pallas import tpu as pltpu


def _round_up(x: int, m: int) -> int:
    return ((x + m - 1) // m) * m


def _cdiv(a: int, b: int) -> int:
    return (a + b - 1) // b


def _critic_mlp_kernel(state_ref, act_ref, w1s_ref, w1a_ref, b1_ref,
                       w2_ref, b2_ref, w3_ref, b3_ref, o_ref):
    """One (batch-tile, agent) step of the fused critic MLP.

    state_ref : [TB, 1, 1, S]  state rows of TB batches for this agent
    act_ref   : [TB, NA]       joint actions, one row per batch (shared by all
                               agents of the batch -> VMEM resident across the
                               inner agent grid axis)
    w1s/w1a   : layer-1 weight split into state / joint-action halves
    o_ref     : [1, 1, TB]     lane-dense Q-values for (agent, batch tile)
    """
    f32 = jnp.float32
    cdt = w1s_ref.dtype

    x = state_ref[:, 0, 0, :].astype(cdt)               # [TB, S]
    a = act_ref[...].astype(cdt)                         # [TB, NA]

    # ---- layer 1 (f32 accumulation): state half + joint-action half --------
    h1 = jnp.dot(x, w1s_ref[...], preferred_element_type=f32)        # [TB, Hp]
    h1 = h1 + jnp.dot(a, w1a_ref[...], preferred_element_type=f32)
    h1 = jnp.maximum(h1 + b1_ref[...], 0.0)

    # ---- layer 2 ------------------------------------------------------------
    h2 = jnp.dot(h1.astype(cdt), w2_ref[...], preferred_element_type=f32)
    h2 = jnp.maximum(h2 + b2_ref[...], 0.0)                          # [TB, Hp]

    # ---- layer 3 (out_dim == 1): w3[1,Hp] x h2^T -> [1, TB] -----------------
    # Result lands with the batch on the lane axis -> lane-dense store.
    q = jax.lax.dot_general(w3_ref[...], h2.astype(cdt),
                            dimension_numbers=(((1,), (1,)), ((), ())),
                            preferred_element_type=f32)              # [1, TB]
    o_ref[0, :, :] = (q + b3_ref[...]).astype(o_ref.dtype)


class MIR3CriticPallas:
    """JAX/Pallas re-implementation of MIR3Critic (share_params=True, MLPBase)."""

    def __init__(self, state_shape, action_shape, n_agents, hidden_dim=64,
                 key=None, compute_dtype=jnp.bfloat16, max_batch_tile=1024):
        self.state_shape = int(state_shape)
        self.action_shape = int(action_shape)
        self.n_agents = int(n_agents)
        self.hidden_dim = int(hidden_dim)
        self.compute_dtype = compute_dtype
        # Batch-tile cap: multiple of 128 so multi-tile grids keep the
        # lane-dense (1, 1, TB) output block legal; per-step f32 intermediates
        # (~2*TB*Hp*4 B) stay far below v7x's 32 MiB scoped VMEM at this cap.
        self._max_batch_tile = max(128, (int(max_batch_tile) // 128) * 128)

        in_dim = self.state_shape + self.n_agents * self.action_shape
        if key is None:
            key = jax.random.PRNGKey(0)
        k1, k2, k3 = jax.random.split(key, 3)

        def init_linear(k, fan_in, fan_out):
            # PyTorch nn.Linear default init: U(-1/sqrt(fan_in), +1/sqrt(fan_in))
            bound = 1.0 / (fan_in ** 0.5)
            kw, kb = jax.random.split(k)
            w = jax.random.uniform(kw, (fan_in, fan_out), jnp.float32, -bound, bound)
            b = jax.random.uniform(kb, (fan_out,), jnp.float32, -bound, bound)
            return w, b

        # canonical f32 parameters (exact PyTorch-equivalent semantics)
        self.ref_w1, self.ref_b1 = init_linear(k1, in_dim, self.hidden_dim)
        self.ref_w2, self.ref_b2 = init_linear(k2, self.hidden_dim, self.hidden_dim)
        self.ref_w3, self.ref_b3 = init_linear(k3, self.hidden_dim, 1)

        # kernel-side packing: split W1 into state / joint-action rows, pad the
        # hidden dim to a lane-dense multiple of 128 (padded lanes stay exactly
        # zero through ReLU and are zero-weighted by w3), cast MXU operands.
        Hp = _round_up(self.hidden_dim, 128)
        ph = Hp - self.hidden_dim
        self.hidden_pad = Hp
        S = self.state_shape
        self.w1s = jnp.pad(self.ref_w1[:S], ((0, 0), (0, ph))).astype(compute_dtype)
        self.w1a = jnp.pad(self.ref_w1[S:], ((0, 0), (0, ph))).astype(compute_dtype)
        self.b1 = jnp.pad(self.ref_b1, (0, ph)).reshape(1, Hp).astype(jnp.float32)
        self.w2 = jnp.pad(self.ref_w2, ((0, ph), (0, ph))).astype(compute_dtype)
        self.b2 = jnp.pad(self.ref_b2, (0, ph)).reshape(1, Hp).astype(jnp.float32)
        self.w3 = jnp.pad(self.ref_w3[:, 0], (0, ph)).reshape(1, Hp).astype(compute_dtype)
        self.b3 = self.ref_b3.reshape(1, 1).astype(jnp.float32)

    def _batch_tiling(self, B):
        # Number of tiles first (bounded padding), then an 8/128-aligned tile.
        cap = self._max_batch_tile
        n_tiles = max(1, _cdiv(B, cap))
        if n_tiles == 1:
            tb = _round_up(B, 8)                   # waste <= 7 rows
        else:
            tb = _round_up(_cdiv(B, n_tiles), 128)  # waste < 128 rows per tile
        return n_tiles, tb

    def __call__(self, state, actions, hidden_state):
        """
        state:        [B, N, state_shape]
        actions:      [B, N, action_shape]
        hidden_state: [B, N, hidden_dim] (passed through for MLPBase)
        returns (out [B, N, 1], hs [B, N, hidden_dim])
        """
        B, N, A = actions.shape
        assert N == self.n_agents
        S = state.shape[-1]
        assert S == self.state_shape
        NA = N * A
        Hp = self.hidden_pad

        # Free (metadata-only) reshapes; no astype / pad HBM passes.
        state_4d = state.reshape(B, N, 1, S)
        actions_2d = actions.reshape(B, NA)

        n_tiles, TB = self._batch_tiling(B)
        B_ceil = n_tiles * TB
        grid = (n_tiles, N)   # inner axis = agents -> actions block stays resident

        weights = (self.w1s, self.w1a, self.b1, self.w2, self.b2, self.w3, self.b3)
        weight_bytes = sum(int(w.size) * w.dtype.itemsize for w in weights)
        rows = B_ceil * N
        cost = pl.CostEstimate(
            flops=int(2 * rows * Hp * (S + NA + Hp + 1)),
            transcendentals=0,
            bytes_accessed=int(state.size * state.dtype.itemsize
                               + n_tiles * actions_2d.size * actions_2d.dtype.itemsize
                               + weight_bytes + N * B_ceil * 4),
        )

        q = pl.pallas_call(
            _critic_mlp_kernel,
            out_shape=jax.ShapeDtypeStruct((N, 1, B_ceil), jnp.float32),
            grid=grid,
            in_specs=[
                # state rows of TB batches for agent i (rectangular sub-block)
                pl.BlockSpec((TB, 1, 1, S), lambda j, i: (j, i, 0, 0)),
                # joint actions: one row per batch, shared across the agent axis
                pl.BlockSpec((TB, NA), lambda j, i: (j, 0)),
                # weights / biases: constant index maps -> fetched once, VMEM resident
                pl.BlockSpec((S, Hp), lambda j, i: (0, 0)),
                pl.BlockSpec((NA, Hp), lambda j, i: (0, 0)),
                pl.BlockSpec((1, Hp), lambda j, i: (0, 0)),
                pl.BlockSpec((Hp, Hp), lambda j, i: (0, 0)),
                pl.BlockSpec((1, Hp), lambda j, i: (0, 0)),
                pl.BlockSpec((1, Hp), lambda j, i: (0, 0)),
                pl.BlockSpec((1, 1), lambda j, i: (0, 0)),
            ],
            out_specs=pl.BlockSpec((1, 1, TB), lambda j, i: (i, 0, j)),
            compiler_params=pltpu.CompilerParams(
                dimension_semantics=("parallel", "parallel"),
                vmem_limit_bytes=32 * 1024 * 1024,
            ),
            cost_estimate=cost,
        )(state_4d, actions_2d, *weights)

        # Tiny [N, B] -> [B, N, 1] relayout on B*N scalars (negligible).
        out = jnp.transpose(q[:, 0, :B]).reshape(B, N, 1)
        # TODO(synk): RNNBase / share_params=False branches not implemented;
        # hidden_state is passed through unchanged (MLPBase contract).
        return out, hidden_state


def _reference_forward(critic, state, actions, hidden_state):
    """Pure-JAX f32 reference mirroring the PyTorch module exactly."""
    B, N, A = actions.shape
    joint = jnp.broadcast_to(actions[:, None, :, :], (B, N, N, A)).reshape(B, N, N * A)
    x = jnp.concatenate([state, joint], axis=2).reshape(B * N, -1)
    h1 = jnp.maximum(x @ critic.ref_w1 + critic.ref_b1, 0.0)
    h2 = jnp.maximum(h1 @ critic.ref_w2 + critic.ref_b2, 0.0)
    q = h2 @ critic.ref_w3 + critic.ref_b3
    return q.reshape(B, N, 1), hidden_state


if __name__ == "__main__":
    # Small shapes consistent with the module's forward contract.
    B, N = 8, 4                 # batch, n_agents
    state_shape = 16            # global state features
    action_shape = 4            # per-agent action features
    hidden_dim = 32

    key = jax.random.PRNGKey(0)
    kp, ks, ka, kh = jax.random.split(key, 4)

    state = jax.random.normal(ks, (B, N, state_shape), jnp.float32)
    actions = jax.random.normal(ka, (B, N, action_shape), jnp.float32)
    hidden_state = jax.random.normal(kh, (B, N, hidden_dim), jnp.float32)

    # Exact-precision path (f32 MXU operands) -> tight check vs. the reference.
    critic_f32 = MIR3CriticPallas(state_shape, action_shape, N,
                                  hidden_dim=hidden_dim, key=kp,
                                  compute_dtype=jnp.float32)
    out_f32, hs = critic_f32(state, actions, hidden_state)
    out_f32 = jax.block_until_ready(out_f32)
    hs = jax.block_until_ready(hs)
    assert out_f32.shape == (B, N, 1), out_f32.shape
    assert hs.shape == (B, N, hidden_dim), hs.shape

    ref_out, _ = _reference_forward(critic_f32, state, actions, hidden_state)
    assert jnp.allclose(out_f32, ref_out, atol=1e-4, rtol=1e-4), \
        float(jnp.max(jnp.abs(out_f32 - ref_out)))

    # Ragged batch (not a multiple of 8): handled via Pallas partial trailing
    # blocks -- no wrapper-side padding of state/actions.
    Br = 5
    out_r, _ = critic_f32(state[:Br], actions[:Br], hidden_state[:Br])
    out_r = jax.block_until_ready(out_r)
    assert out_r.shape == (Br, N, 1), out_r.shape
    assert jnp.allclose(out_r, ref_out[:Br], atol=1e-4, rtol=1e-4), \
        float(jnp.max(jnp.abs(out_r - ref_out[:Br])))

    # Default (recommended) path: bf16 MXU operands, f32 accumulation.
    critic_bf16 = MIR3CriticPallas(state_shape, action_shape, N,
                                   hidden_dim=hidden_dim, key=kp)
    out_bf16, _ = critic_bf16(state, actions, hidden_state)
    out_bf16 = jax.block_until_ready(out_bf16)
    assert out_bf16.shape == (B, N, 1), out_bf16.shape
    assert jnp.allclose(out_bf16, ref_out, atol=2e-2, rtol=2e-2), \
        float(jnp.max(jnp.abs(out_bf16 - ref_out)))

    print("KERNEL_OK")
</pallas_src>

<mosaic_0001>
module attributes {stable_mosaic.version = 11 : i64} {
  func.func @_critic_mlp_kernel(%arg0: i32, %arg1: i32, %arg2: memref<8x1x1x16xf32, #tpu.memory_space<vmem>>, %arg3: memref<8x16xf32, #tpu.memory_space<vmem>>, %arg4: memref<16x128xf32, #tpu.memory_space<vmem>>, %arg5: memref<16x128xf32, #tpu.memory_space<vmem>>, %arg6: memref<1x128xf32, #tpu.memory_space<vmem>>, %arg7: memref<128x128xf32, #tpu.memory_space<vmem>>, %arg8: memref<1x128xf32, #tpu.memory_space<vmem>>, %arg9: memref<1x128xf32, #tpu.memory_space<vmem>>, %arg10: memref<1x1xf32, #tpu.memory_space<vmem>>, %arg11: memref<1x1x8xf32, #tpu.memory_space<vmem>>) attributes {dimension_semantics = [#tpu.dimension_semantics<parallel>, #tpu.dimension_semantics<parallel>], iteration_bounds = array<i64: 1, 4>, scalar_prefetch = 0 : i64, scratch_operands = 0 : i64, tpu.core_type = #tpu.core_type<tc>, window_params = [{transform_indices = @transform_0, window_bounds = array<i64: 8, 1, 1, 16>}, {transform_indices = @transform_1, window_bounds = array<i64: 8, 16>}, {pipeline_mode = #tpu.pipeline_mode<synchronous>, transform_indices = @transform_2, window_bounds = array<i64: 16, 128>}, {pipeline_mode = #tpu.pipeline_mode<synchronous>, transform_indices = @transform_3, window_bounds = array<i64: 16, 128>}, {pipeline_mode = #tpu.pipeline_mode<synchronous>, transform_indices = @transform_4, window_bounds = array<i64: 1, 128>}, {pipeline_mode = #tpu.pipeline_mode<synchronous>, transform_indices = @transform_5, window_bounds = array<i64: 128, 128>}, {pipeline_mode = #tpu.pipeline_mode<synchronous>, transform_indices = @transform_6, window_bounds = array<i64: 1, 128>}, {pipeline_mode = #tpu.pipeline_mode<synchronous>, transform_indices = @transform_7, window_bounds = array<i64: 1, 128>}, {pipeline_mode = #tpu.pipeline_mode<synchronous>, transform_indices = @transform_8, window_bounds = array<i64: 1, 1>}, {transform_indices = @transform_9, window_bounds = array<i64: 1, 1, 8>}]} {
    %c0 = arith.constant 0 : index
    %c0_0 = arith.constant 0 : index
    %c0_1 = arith.constant 0 : index
    %c0_2 = arith.constant 0 : index
    %0 = vector.load %arg2[%c0, %c0_0, %c0_1, %c0_2] : memref<8x1x1x16xf32, #tpu.memory_space<vmem>>, vector<8x1x1x16xf32>
    %1 = vector.shape_cast %0 : vector<8x1x1x16xf32> to vector<8x16xf32>
    %c0_3 = arith.constant 0 : index
    %c0_4 = arith.constant 0 : index
    %2 = vector.load %arg3[%c0_3, %c0_4] : memref<8x16xf32, #tpu.memory_space<vmem>>, vector<8x16xf32>
    %c0_5 = arith.constant 0 : index
    %c0_6 = arith.constant 0 : index
    %3 = vector.load %arg4[%c0_5, %c0_6] : memref<16x128xf32, #tpu.memory_space<vmem>>, vector<16x128xf32>
    %cst = arith.constant dense<0.000000e+00> : vector<8x128xf32>
    %4 = tpu.matmul %1, %3, %cst {dimension_numbers = #tpu.dot_dimension_numbers<[1], [0], [0], [1], [0, 0, 1, 1], [], []>} : vector<8x16xf32>, vector<16x128xf32>, vector<8x128xf32> -> vector<8x128xf32>
    %c0_7 = arith.constant 0 : index
    %c0_8 = arith.constant 0 : index
    %5 = vector.load %arg5[%c0_7, %c0_8] : memref<16x128xf32, #tpu.memory_space<vmem>>, vector<16x128xf32>
    %cst_9 = arith.constant dense<0.000000e+00> : vector<8x128xf32>
    %6 = tpu.matmul %2, %5, %cst_9 {dimension_numbers = #tpu.dot_dimension_numbers<[1], [0], [0], [1], [0, 0, 1, 1], [], []>} : vector<8x16xf32>, vector<16x128xf32>, vector<8x128xf32> -> vector<8x128xf32>
    %7 = arith.addf %4, %6 : vector<8x128xf32>
    %c0_10 = arith.constant 0 : index
    %c0_11 = arith.constant 0 : index
    %8 = vector.load %arg6[%c0_10, %c0_11] : memref<1x128xf32, #tpu.memory_space<vmem>>, vector<1x128xf32>
    %9 = vector.broadcast %8 : vector<1x128xf32> to vector<8x128xf32>
    %10 = arith.addf %7, %9 : vector<8x128xf32>
    %cst_12 = arith.constant 0.000000e+00 : f32
    %11 = vector.broadcast %cst_12 : f32 to vector<8x128xf32>
    %12 = arith.maximumf %10, %11 : vector<8x128xf32>
    %c0_13 = arith.constant 0 : index
    %c0_14 = arith.constant 0 : index
    %13 = vector.load %arg7[%c0_13, %c0_14] : memref<128x128xf32, #tpu.memory_space<vmem>>, vector<128x128xf32>
    %cst_15 = arith.constant dense<0.000000e+00> : vector<8x128xf32>
    %14 = tpu.matmul %12, %13, %cst_15 {dimension_numbers = #tpu.dot_dimension_numbers<[1], [0], [0], [1], [0, 0, 1, 1], [], []>} : vector<8x128xf32>, vector<128x128xf32>, vector<8x128xf32> -> vector<8x128xf32>
    %c0_16 = arith.constant 0 : index
    %c0_17 = arith.constant 0 : index
    %15 = vector.load %arg8[%c0_16, %c0_17] : memref<1x128xf32, #tpu.memory_space<vmem>>, vector<1x128xf32>
    %16 = vector.broadcast %15 : vector<1x128xf32> to vector<8x128xf32>
    %17 = arith.addf %14, %16 : vector<8x128xf32>
    %cst_18 = arith.constant 0.000000e+00 : f32
    %18 = vector.broadcast %cst_18 : f32 to vector<8x128xf32>
    %19 = arith.maximumf %17, %18 : vector<8x128xf32>
    %c0_19 = arith.constant 0 : index
    %c0_20 = arith.constant 0 : index
    %20 = vector.load %arg9[%c0_19, %c0_20] : memref<1x128xf32, #tpu.memory_space<vmem>>, vector<1x128xf32>
    %cst_21 = arith.constant dense<0.000000e+00> : vector<1x8xf32>
    %21 = tpu.matmul %20, %19, %cst_21 {dimension_numbers = #tpu.dot_dimension_numbers<[1], [1], [0], [0], [0, 0, 1, 0], [], []>} : vector<1x128xf32>, vector<8x128xf32>, vector<1x8xf32> -> vector<1x8xf32>
    %c0_22 = arith.constant 0 : index
    %c0_23 = arith.constant 0 : index
    %22 = vector.load %arg10[%c0_22, %c0_23] : memref<1x1xf32, #tpu.memory_space<vmem>>, vector<1x1xf32>
    %23 = vector.broadcast %22 : vector<1x1xf32> to vector<1x8xf32>
    %24 = arith.addf %21, %23 : vector<1x8xf32>
    %c0_24 = arith.constant 0 : index
    %c0_25 = arith.constant 0 : index
    %c0_26 = arith.constant 0 : index
    %25 = vector.load %arg11[%c0_24, %c0_25, %c0_26] : memref<1x1x8xf32, #tpu.memory_space<vmem>>, vector<1x1x8xf32>
    %26 = vector.shape_cast %25 : vector<1x1x8xf32> to vector<1x8xf32>
    %27 = vector.shape_cast %24 : vector<1x8xf32> to vector<1x1x8xf32>
    tpu.vector_store %arg11[%c0_24, %c0_25, %c0_26], %27 {strides = array<i32>} : memref<1x1x8xf32, #tpu.memory_space<vmem>>, vector<1x1x8xf32>,
    return
  }
  func.func @transform_0(%arg0: i32, %arg1: i32) -> (i32, i32, i32, i32) {
    %c0_i32 = arith.constant 0 : i32
    %c0_i32_0 = arith.constant 0 : i32
    %c0_i32_1 = arith.constant 0 : i32
    return %arg0, %arg1, %c0_i32, %c0_i32_0 : i32, i32, i32, i32
  }
  func.func @transform_1(%arg0: i32, %arg1: i32) -> (i32, i32) {
    %c0_i32 = arith.constant 0 : i32
    %c0_i32_0 = arith.constant 0 : i32
    return %arg0, %c0_i32 : i32, i32
  }
  func.func @transform_2(%arg0: i32, %arg1: i32) -> (i32, i32) {
    %c0_i32 = arith.constant 0 : i32
    %c0_i32_0 = arith.constant 0 : i32
    %c0_i32_1 = arith.constant 0 : i32
    return %c0_i32, %c0_i32_0 : i32, i32
  }
  func.func @transform_3(%arg0: i32, %arg1: i32) -> (i32, i32) {
    %c0_i32 = arith.constant 0 : i32
    %c0_i32_0 = arith.constant 0 : i32
    %c0_i32_1 = arith.constant 0 : i32
    return %c0_i32, %c0_i32_0 : i32, i32
  }
  func.func @transform_4(%arg0: i32, %arg1: i32) -> (i32, i32) {
    %c0_i32 = arith.constant 0 : i32
    %c0_i32_0 = arith.constant 0 : i32
    %c0_i32_1 = arith.constant 0 : i32
    return %c0_i32, %c0_i32_0 : i32, i32
  }
  func.func @transform_5(%arg0: i32, %arg1: i32) -> (i32, i32) {
    %c0_i32 = arith.constant 0 : i32
    %c0_i32_0 = arith.constant 0 : i32
    %c0_i32_1 = arith.constant 0 : i32
    return %c0_i32, %c0_i32_0 : i32, i32
  }
  func.func @transform_6(%arg0: i32, %arg1: i32) -> (i32, i32) {
    %c0_i32 = arith.constant 0 : i32
    %c0_i32_0 = arith.constant 0 : i32
    %c0_i32_1 = arith.constant 0 : i32
    return %c0_i32, %c0_i32_0 : i32, i32
  }
  func.func @transform_7(%arg0: i32, %arg1: i32) -> (i32, i32) {
    %c0_i32 = arith.constant 0 : i32
    %c0_i32_0 = arith.constant 0 : i32
    %c0_i32_1 = arith.constant 0 : i32
    return %c0_i32, %c0_i32_0 : i32, i32
  }
  func.func @transform_8(%arg0: i32, %arg1: i32) -> (i32, i32) {
    %c0_i32 = arith.constant 0 : i32
    %c0_i32_0 = arith.constant 0 : i32
    %c0_i32_1 = arith.constant 0 : i32
    return %c0_i32, %c0_i32_0 : i32, i32
  }
  func.func @transform_9(%arg0: i32, %arg1: i32) -> (i32, i32, i32) {
    %c0_i32 = arith.constant 0 : i32
    %c0_i32_0 = arith.constant 0 : i32
    return %arg1, %c0_i32, %arg0 : i32, i32, i32
  }
}

</mosaic_0001>

<bundles_post_ra>
// kernel: tpu_custom_call.1
= control target key start
LH: loop header
LB: loop body
LE: loop exit
PB: predicated region body
PF: predicated region fallthrough
CT: control target
= control target key end

     0   :  { %s1365_s0 = inlined_call_operand.hbm [shape: f32[8,4,1,16], index: 0, kind: input, shape index: {}]   ;;  %s1366_s1 = inlined_call_operand.hbm [shape: f32[8,16], index: 1, kind: input, shape index: {}]   ;;  %s1367_s2 = inlined_call_operand.hbm [shape: f32[16,128], index: 2, kind: input, shape index: {}]   ;;  %s1368_s3 = inlined_call_operand.hbm [shape: f32[16,128], index: 3, kind: input, shape index: {}]   ;;  %s1369_s4 = inlined_call_operand.vmem [shape: f32[1,128], index: 4, kind: input, shape index: {}]   ;;  %s1370_s5 = inlined_call_operand.hbm [shape: f32[128,128], index: 5, kind: input, shape index: {}]   ;;  %s1371_s6 = inlined_call_operand.vmem [shape: f32[1,128], index: 6, kind: input, shape index: {}]   ;;  %s1372_s7 = inlined_call_operand.vmem [shape: f32[1,128], index: 7, kind: input, shape index: {}]   ;;  %s1373_s8 = inlined_call_operand.<no memory space> [shape: f32[1,1], index: 8, kind: input, shape index: {}]   ;;  %s1374_s9 = inlined_call_operand.hbm [shape: f32[4,1,8], index: 9, kind: output, shape index: {}]  }
   0x1   :  { %1377 = sst [smem:[#allocation19_spill]] %s1366_s1  ;;  %v14_v0 = vstv %s1373_s8 }
   0x2   :  { %1378 = sst [smem:[#allocation20_spill]] %s1367_s2  ;;  %15 = vst [vmem:[#allocation2] sm:$0x1] %v14_v0 }
   0x3   :  { %1379 = sst [smem:[#allocation21_spill]] %s1368_s3 }
   0x4   :  { %1380 = sst [smem:[#allocation22_spill]] %s1370_s5 }
   0x5   :  { %16 = vsyncpa [#allocation4], 0 }
   0x6   :  { %18 = vsyncpa [#allocation4 + $0x1], 0 }
   0x7   :  { %19 = vsyncpa [#allocation7], 0 }
   0x8   :  { %20 = vsyncpa [#allocation10], 0 }
   0x9   :  { %21 = vsyncpa [#allocation5], 0 }
   0xa   :  { %23 = vsyncpa [#allocation5 + $0x1], 0  ;;  %s1169_s11 = smov 0   ;;  %s1171_s12 = smov 0  }
   0xb   :  { %s1173_s13 = smov 0   ;;  %s1175_s14 = smov 0  }
   0xc   :  { %s1177_s15 = smov 0   ;;  %s1179_s16 = smov 0  }
   0xd LB: > { %s733_s8 = sadd.s32 4294967295, %s1104_s16   ;;  %s734_s17 = sadd.s32 4294967294, %s1104_s16   ;;  %s1104_s16 = sphi %s1179_s16, %s29_s16   ;;  %s1100_s15 = sphi %s1177_s15, %s1401_s15   ;;  %s1096_s14 = sphi %s1175_s14, %s1400_s14   ;;  %s1092_s13 = sphi %s1173_s13, %s1399_s13   ;;  %s1088_s12 = sphi %s1171_s12, %s1398_s12   ;;  %s1084_s11 = sphi %s1169_s11, %s1397_s11  }
   0xe   : > { %p63_p0 = scmp.ne.s32.totalorder %s1088_s12, %s1084_s11  ;;  %p1203_p1 = scmp.eq.s32.totalorder %s733_s8, 0 }
   0xf   : > { %p1207_p2 = scmp.eq.s32.totalorder %s733_s8, 3  ;;  %p268_p3 = scmp.eq.s32.totalorder %s734_s17, 3 }
  0x10   : > { %p1213_p4 = por %p1203_p1, %p63_p0  ;;  %p735_p5 = scmp.ge.s32.totalorder %s1104_s16, 1 }
  0x11   : > { %p1218_p6 = por %p268_p3, %p63_p0  ;;  %p275_p7 = scmp.lt.s32.totalorder %s1104_s16, 5 }
  0x12   : > { %s1386_s1 = sld [smem:[#allocation19_spill]]  ;;  %s1106_s26 = smov [#allocation6]  }
  0x13   : > { %s1384_s21 = scalar_select %p1218_p6, 1, 0 }
  0x14   : > { %p1226_p8 = pnand %p735_p5, %p275_p7  ;;  %s291_s27 = sshll.u32 %s1106_s26, 4  ;;  %s292_s27 = int_to_ptr.vmem [resolvable:$true] %s291_s27 }
  0x15   : > { %1385 = sst [smem:[#allocation17_spill]] %s1384_s21  ;;  %s1107_s8 = smov [#allocation9]  }
  0x16   : > { %p772_p9 = pneg %p1226_p8  ;;  %s1389_s3 = sld [smem:[#allocation21_spill]] }
  0x17   : > { %s316_s17 = sshll.u32 %s1107_s8, 4  ;;  %s1390_s2 = sld [smem:[#allocation20_spill]]  ;;  %s317_s17 = int_to_ptr.vmem [resolvable:$true] %s316_s17 }
  0x18   : > { %s289_s24 = sshll.u32 %s1386_s1, 4  ;;  %p1234_p10 = pnand %p772_p9, %p1203_p1  ;;  %s290_s24 = int_to_ptr.hbm [resolvable:$true] %s289_s24 }
  0x19   : > { %s1108_s1 = smov 128   ;;  %s1109_s29 = smov 8  }
  0x1a   : > { %775 = dma.hbm_to_vmem [thread:$0]  (!%p1234_p10), %s290_s24, 128, %s292_s27, [#allocation7]  }
  0x1b   : > { %s1391_s5 = sld [smem:[#allocation22_spill]]  ;;  %s1110_s8 = smov [#allocation8]  }
  0x1c   : > { %s314_s10 = sshll.u32 %s1389_s3, 4  ;;  %s302_s22 = sshll.u32 %s1110_s8, 4  ;;  %s315_s10 = int_to_ptr.hbm [resolvable:$true] %s314_s10  ;;  %s303_s22 = int_to_ptr.vmem [resolvable:$true] %s302_s22 }
  0x1d   : > { %s300_s26 = sshll.u32 %s1390_s2, 4  ;;  %s1111_s23 = smov [#allocation11]   ;;  %s301_s26 = int_to_ptr.hbm [resolvable:$true] %s300_s26 }
  0x1e   : > { %781 = dma.hbm_to_vmem [thread:$0]  (!%p1234_p10), %s315_s10, 256, %s317_s17, [#allocation10], %s1108_s1, %s1108_s1, %s1109_s29  }
  0x1f   : > { %778 = dma.hbm_to_vmem [thread:$0]  (!%p1234_p10), %s301_s26, 256, %s303_s22, [#allocation7], %s1108_s1, %s1108_s1, %s1109_s29  }
  0x20   : > { %s333_s2 = sshll.u32 %s1111_s23, 4  ;;  %s38_s10 = sadd.s32 1, %s1100_s15  ;;  %s334_s2 = int_to_ptr.vmem [resolvable:$true] %s333_s2 }
  0x21   : > { %s331_s27 = sshll.u32 %s1391_s5, 4  ;;  %s50_s17 = sadd.s32 1, %s1092_s13  ;;  %s332_s27 = int_to_ptr.hbm [resolvable:$true] %s331_s27 }
  0x22   : > { %784 = dma.hbm_to_vmem [thread:$0]  (!%p1234_p10), %s332_s27, 2048, %s334_s2, [#allocation10], %s1108_s1, %s1108_s1, %s1109_s29  }
  0x23   : > { %p39_p11 = scmp.ge.s32.totalorder %s38_s10, 4  ;;  %p57_p12 = scmp.ne.s32.totalorder %s1092_s13, %s1088_s12 }
  0x24   : > { %p58_p13 = scmp.eq.s32.totalorder %s1104_s16, 0  ;;  %p797_p0 = scmp.lt.s32.totalorder %s1104_s16, 4 }
  0x25   : > { %s1403_s10 = smov (%p39_p11, %s38_s10), 0  ;;  %p1269_p5 = por %p1207_p2, %p57_p12 }
  0x26   : > { %1392 = sst [smem:[#allocation18_spill]] %s1403_s10  ;;  %p1263_p3 = por %p58_p13, %p57_p12 }
  0x27   : > { %s46_s1 = ssub.s32 %s1100_s15, %s1403_s10  ;;  %s356_s2 = sand.u32 1, %s1092_s13  }
  0x28   : > { %p48_p7 = scmp.eq.s32.totalorder %s46_s1, 0  ;;  %s741_s26 = sshll.u32 %s356_s2, 3 }
  0x29   : > { %s366_s27 = scalar_lea.hbm %s1365_s0, %s1100_s15  ;;  %s360_s23 = scalar_lea.vmem [#allocation3], %s741_s26 }
  0x2a   : > { %s1281_s8 = scalar_select %p48_p7, %s1092_s13, %s50_s17  }
  0x2b   : > { %s367_s22 = sshll.u32 %s366_s27, 4  ;;  %s369_s3 = sshll.u32 %s360_s23, 4  ;;  %s368_s22 = int_to_ptr.hbm [resolvable:$true] %s367_s22  ;;  %s370_s3 = int_to_ptr.vmem [resolvable:$true] %s369_s3 }
  0x2c   : > { %p786_p2 = pnand %p797_p0, %p1263_p3  ;;  %s357_s19 = scalar_lea.sflag [#allocation4], %s356_s2 }
  0x2d   : > { %s1112_s5 = smov 64   ;;  %s1113_s10 = smov 16  }
  0x2e   : > { %s1114_s21 = smov 1   ;;  %381 = sbr.rel (%p1226_p8) target bundleno = 482 (0x1e2), region = 56 }
  0x2f   : > { %788 = dma.hbm_to_vmem [thread:$0]  (!%p786_p2), %s368_s22, 128, %s370_s3, %s357_s19, %s1112_s5, %s1113_s10, %s1114_s21  }
  0x30   : > { %s1290_s17 = sand.u32 (!%p1226_p8), 1, %s1088_s12  }
  0x31   : > { %s743_s1 = sshll.u32 (!%p1226_p8), %s1290_s17, 3  ;;  %s384_s26 = scalar_lea.sflag (!%p1226_p8), [#allocation4], %s1290_s17 }
  0x32   : > { %s1294_s29 = scalar_lea.vmem (!%p1226_p8), [#allocation3], %s743_s1 }
  0x33   : > { %1067 = dma.done.wait (%p1213_p4), %s384_s26, 128  }
  0x34   : > { %1069 = vsyncadd (%p1213_p4), %s384_s26, 4294967168 }
  0x35   : > { %1071 = dma.done.wait (%p1203_p1), [#allocation7], 384  }
  0x36   : > { %1073 = vsyncadd (%p1203_p1), [#allocation7], 4294966912 }
  0x37   : > { %1075 = dma.done.wait (%p1203_p1), [#allocation10], 2304  }
  0x38   : > { %1077 = vsyncadd (%p1203_p1), [#allocation10], 4294964992  ;;  %v455_v1 = vld [vmem:[#allocation9 + $0x8] sm:$0xff]  ;;  %v453_v2 = vld [vmem:[#allocation8 + $0x8] sm:$0xff]  ;;  %vm456_vm0 = vcmask 130048   ;;  %v1115_v38 = vmov 0   ;;  %s613_s2 = scalar_lea.hbm %s1374_s9, %s1096_s14 }
  0x39   : > { %v454_v3 = vld [vmem:[#allocation9] sm:$0xff]  ;;  %474 = vmatpush.msra.mxu0 %v455_v1  ;;  %520 = vmatpush.msra.mxu1 %v453_v2  ;;  %v452_v4 = vld [vmem:[#allocation8] sm:$0xff]  ;;  %v451_v5 = vld [vmem:[#allocation6] sm:$0xff]  ;;  %s441_s24 = scalar_lea.vmem [#allocation12], %s1290_s17  ;;  %s617_s22 = sshll.u32 %s613_s2, 4  ;;  %vm601_vm1 = vcmask 57344   ;;  %s618_s22 = int_to_ptr.hbm [resolvable:$true] %s617_s22 }
  0x3a   : > { %v443_v6 = vld [vmem:[%s1294_s29] sm:$0x1]  ;;  %v444_v7 = vld [vmem:[%s1294_s29 + $0x1] sm:$0x1]  ;;  %v445_v8 = vld [vmem:[%s1294_s29 + $0x2] sm:$0x1]  ;;  %861 = vset.pattern.permute.xlu0 %v1115_v38 }
  0x3b   : > { %475 = vmatpush.msra.mxu0 %v454_v3  ;;  %521 = vmatpush.msra.mxu1 %v452_v4  ;;  %v446_v9 = vld [vmem:[%s1294_s29 + $0x3] sm:$0x1]  ;;  %488 = vst [vmem:[#allocation1] ss:$9 sm:$0xff] %v443_v6  ;;  %v547_v10 = vld [vmem:[#allocation11 + $0x78] sm:$0xff]  ;;  %v544_v17 = vld [vmem:[#allocation11 + $0x60] sm:$0xff] }
  0x3c   : > { %748 = vmatmul.msk.f32.vlgmr.msra.gmra.mxu0 %vm456_vm0, %v451_v5  ;;  %v546_v11 = vld [vmem:[#allocation11 + $0x70] sm:$0xff]  ;;  %490 = vst [vmem:[#allocation1 + $0x1] ss:$9 sm:$0xff] %v444_v7  ;;  %552 = vmatpush.msra.mxu2 %v547_v10  ;;  %v545_v14 = vld [vmem:[#allocation11 + $0x68] sm:$0xff]  ;;  %v543_v18 = vld [vmem:[#allocation11 + $0x58] sm:$0xff]  ;;  %s615_s27 = sshll.u32 %s441_s24, 4  ;;  %s616_s27 = int_to_ptr.vmem [resolvable:$true] %s615_s27 }
  0x3d   : > { %v447_v12 = vld [vmem:[%s1294_s29 + $0x4] sm:$0x1]  ;;  %v448_v13 = vld [vmem:[%s1294_s29 + $0x5] sm:$0x1]  ;;  %492 = vst [vmem:[#allocation1 + $0x2] ss:$9 sm:$0xff] %v445_v8 }
  0x3e   : > { %v449_v15 = vld [vmem:[%s1294_s29 + $0x6] sm:$0x1]  ;;  %v450_v16 = vld [vmem:[%s1294_s29 + $0x7] sm:$0x1]  ;;  %494 = vst [vmem:[#allocation1 + $0x3] ss:$9 sm:$0xff] %v446_v9  ;;  %553 = vmatpush.msra.mxu2 %v546_v11 }
  0x3f   : > { %496 = vst [vmem:[#allocation1 + $0x4] ss:$9 sm:$0xff] %v447_v12  ;;  %v542_v19 = vld [vmem:[#allocation11 + $0x50] sm:$0xff]  ;;  %v541_v20 = vld [vmem:[#allocation11 + $0x48] sm:$0xff]  ;;  %v540_v21 = vld [vmem:[#allocation11 + $0x40] sm:$0xff]  ;;  %s604_s23 = scalar_lea.sflag [#allocation5], %s1290_s17 }
  0x40   : > { %498 = vst [vmem:[#allocation1 + $0x5] ss:$9 sm:$0xff] %v448_v13  ;;  %554 = vmatpush.msra.mxu2 %v545_v14  ;;  %v539_v23 = vld [vmem:[#allocation11 + $0x38] sm:$0xff]  ;;  %v538_v24 = vld [vmem:[#allocation11 + $0x30] sm:$0xff]  ;;  %v537_v25 = vld [vmem:[#allocation11 + $0x28] sm:$0xff]  ;;  %s1028_s19 = sshra.s32 %s618_s22, 4  ;;  %s1029_s19 = int_to_ptr.hbm [resolvable:$true] %s1028_s19 }
  0x41   : > { %500 = vst [vmem:[#allocation1 + $0x6] ss:$9 sm:$0xff] %v449_v15  ;;  %v536_v26 = vld [vmem:[#allocation11 + $0x20] sm:$0xff]  ;;  %v535_v27 = vld [vmem:[#allocation11 + $0x18] sm:$0xff]  ;;  %v534_v28 = vld [vmem:[#allocation11 + $0x10] sm:$0xff]  ;;  %s1030_s1 = scalar_lea.hbm %s1029_s19, 1  ;;  %p1035_p9 = scmp.lt.s32.totalorder %s1029_s19, %s1374_s9 }
  0x42   : > { %502 = vst [vmem:[#allocation1 + $0x7] ss:$9 sm:$0xff] %v450_v16  ;;  %555 = vmatpush.msra.mxu2 %v544_v17  ;;  %v533_v29 = vld [vmem:[#allocation11 + $0x8] sm:$0xff]  ;;  %v532_v30 = vld [vmem:[#allocation11] sm:$0xff]  ;;  %v862_v32 = vld [vmem:[%s1369_s4] ss:$0 sm:$0xff]  ;;  %p1031_p1 = scmp.ne.s32.totalorder %s1029_s19, %s1030_s1 }
  0x43   : > { %v574_v37 = vld [vmem:[#allocation2] sm:$0x1]  ;;  %v863_v39 = vld [vmem:[%s1371_s6] ss:$0 sm:$0xff]  ;;  %s1034_s29 = scalar_lea.hbm %s1374_s9, 4 }
  0x44   : > { %556 = vmatpush.msra.mxu2 %v543_v18  ;;  %577 = vperm.xlu0 %861, %v574_v37   ;;  %v573_v43 = vld [vmem:[%s1372_s7] sm:$0x1]  ;;  %p1032_p4 = pnand %p1031_p1, %p1269_p5  ;;  %p1036_p10 = scmp.lt.s32.totalorder %s1034_s29, %s1030_s1 }
  0x46   : > { %557 = vmatpush.msra.mxu2 %v542_v19  ;;  %p1033_p8 = pneg %p1032_p4  ;;  %p1037_p11 = por %p1036_p10, %p1035_p9 }
  0x48   : > { %558 = vmatpush.msra.mxu2 %v541_v20  ;;  %p1038_p12 = pnand %p1037_p11, %p1033_p8 }
  0x49   : > { %v503_v22 = vld [vmem:[#allocation1] sm:$0xff] }
  0x4a   : > { %749 = vmatmul.msk.f32.vlgmr.msra.gmra.mxu1 %vm456_vm0, %v503_v22  ;;  %559 = vmatpush.msra.mxu2 %v540_v21 }
  0x4c   : > { %560 = vmatpush.msra.mxu2 %v539_v23 }
  0x4e   : > { %561 = vmatpush.msra.mxu2 %v538_v24 }
  0x50   : > { %562 = vmatpush.msra.mxu2 %v537_v25 }
  0x52   : > { %563 = vmatpush.msra.mxu2 %v536_v26 }
  0x54   : > { %564 = vmatpush.msra.mxu2 %v535_v27 }
  0x56   : > { %565 = vmatpush.msra.mxu2 %v534_v28 }
  0x58   : > { %566 = vmatpush.msra.mxu2 %v533_v29 }
  0x5a   : > { %567 = vmatpush.msra.mxu2 %v532_v30 }
  0xb6   : > { %v578_v44 = vpop.permute.xlu0 %577 }
  0xb7   : > { %v580_v45 = vperm.slane %v578_v44, 0 }
  0xb9   : > { %v477_v31 = vpop.f32.mrf.mxu0 }
  0xc7   : > { %v523_v33 = vpop.f32.mrf.mxu1 }
  0xc8   : > { %v524_v34 = vadd.f32 %v523_v33, %v477_v31 }
  0xca   : > { %v530_v35 = vadd.f32 %v862_v32, %v524_v34 }
  0xcc   : > { %v531_v36 = vmax.f32 %v530_v35, 0.0 }
  0xce   : > { %568 = vmatmul.f32.vlgmr.msra.gmra.mxu2 %v531_v36 }
 0x151   : > { %v569_v40 = vpop.f32.mrf.mxu2 }
 0x152   : > { %v570_v41 = vadd.f32 %v863_v39, %v569_v40 }
 0x154   : > { %v572_v42 = vmax.f32 %v570_v41, 0.0 }
 0x156   : > { %596 = vmatpush.xpose.msra.mxu3 %v572_v42 }
 0x159   : > { %597 = vmatmul.f32.vlgmr.msra.gmra.mxu3 %v573_v43 }
 0x1dc   : > { %v598_v46 = vpop.f32.mrf.mxu3 }
 0x1dd   : > { %v599_v47 = vadd.f32 %v598_v46, %v580_v45 }
 0x1df   : > { %602 = vst.msk [vmem:[%s441_s24] sm:$0x1] %vm601_vm1, %v599_v47 }
 0x1e0   : > { %1041 = shalt.err (!%p1038_p12)
}
 0x1e1   : > { %770 = dma.vmem_to_hbm [thread:$0]  (%p1269_p5), %s616_s27, 16, %s618_s22, %s604_s23  }
 0x1e2 PF: > { %p802_p13 = scmp.ge.s32.totalorder %s1104_s16, 2  ;;  %s629_s18 = sand.u32 1, %s1084_s11  }
 0x1e3   : > { %s630_s20 = scalar_lea.sflag [#allocation5], %s629_s18 }
 0x1e4   : > { %p790_p0 = pnand %p802_p13, %p1218_p6 }
 0x1e6   : > { %p791_p3 = pneg %p790_p0 }
 0x1e8   : > { %1079 = dma.done.wait (%p791_p3), %s630_s20, 16  }
 0x1e9   : > { %1081 = vsyncadd (%p791_p3), %s630_s20, 4294967280  ;;  %s29_s16 = sadd.s32 1, %s1104_s16   ;;  %s1396_s28 = sld [smem:[#allocation18_spill]] }
 0x1ea   : > { %p26_p7 = scmp.ge.s32.totalorder %s29_s16, 6   ;;  %s1397_s11 = smov %s1088_s12 }
 0x1eb   : > { %s1398_s12 = smov %s1092_s13  ;;  %s1399_s13 = smov %s1281_s8 }
 0x1ec   : > { %s1400_s14 = smov %s1100_s15  ;;  %28 = sbr.rel (!%p26_p7) target bundleno = 13 (0xd), region = 125 }
 0x1ef   : > { %s1401_s15 = smov %s1396_s28 }
 0x1f1   :  { %635 = vsyncpa [#allocation4], 1 }
 0x1f2   :  { %637 = vsyncpa [#allocation4 + $0x1], 1 }
 0x1f3   :  { %638 = vsyncpa [#allocation7], 1 }
 0x1f4   :  { %639 = vsyncpa [#allocation10], 1 }
 0x1f5   :  { %640 = vsyncpa [#allocation5], 1 }
 0x1f6   :  { %642 = vsyncpa [#allocation5 + $0x1], 1 }

</bundles_post_ra>
